<compile_context>
chip_gen: v6e
topology: v6e:2x2x1
jax: 0.10.0
libtpu: 0.0.40
codegen_flags: <defaults>
</compile_context>

<pallas_src>
import functools

import jax
import jax.numpy as jnp
from jax.experimental import pallas as pl
from jax.experimental.pallas import tpu as pltpu

EPS = 1e-5


def _bn_relu(y, gamma, beta, *, C, W, M, relu):
    """Training-mode BatchNorm2d (+ optional ReLU) on a lane-dense (N*H, W*C) tile.

    One-pass stats: per-channel sum / sum-of-squares reduced over rows and then
    over the W lane-groups; biased variance via E[x^2] - mean^2 (f32), matching
    nn.BatchNorm2d normalization in training mode.  The normalization + affine
    is folded into a single per-lane scale/shift.
    """
    s1 = jnp.sum(y, axis=0, keepdims=True)            # (1, W*C)
    s2 = jnp.sum(y * y, axis=0, keepdims=True)        # (1, W*C)
    # Cross-W reduction via static lane slices (tiny data, robust lowering).
    s1c = s1[:, 0:C]
    s2c = s2[:, 0:C]
    for w in range(1, W):
        s1c = s1c + s1[:, w * C:(w + 1) * C]
        s2c = s2c + s2[:, w * C:(w + 1) * C]
    inv_m = 1.0 / M
    mean = s1c * inv_m                                 # (1, C)
    var = s2c * inv_m - mean * mean                    # biased variance
    a = gamma * jax.lax.rsqrt(var + EPS)               # (1, C)
    b = beta - mean * a                                # (1, C)
    a_t = jnp.concatenate([a] * W, axis=1)             # (1, W*C) lane-tiled
    b_t = jnp.concatenate([b] * W, axis=1)
    out = y * a_t + b_t
    return jnp.maximum(out, 0.0) if relu else out


def bottleneck_kernel(x_ref, w1_ref, w2_ref, w3_ref,
                      g1_ref, b1_ref, g2_ref, b2_ref, g3_ref, b3_ref,
                      o_ref, *, N, H, W, Cin, Cmid, Cout):
    del Cin  # layout already encoded in the block-diagonal weight
    NH = N * H
    M = N * H * W
    WCm = W * Cmid

    x = x_ref[...]                                     # (NH, W*Cin) f32, lane-dense

    # ---- conv1 (1x1) + bn1 + relu: one matmul vs. block-diagonal weight ----
    y1 = jnp.dot(x.astype(jnp.bfloat16), w1_ref[...],
                 preferred_element_type=jnp.float32)   # (NH, W*Cmid) f32
    y1 = _bn_relu(y1, g1_ref[...], b1_ref[...], C=Cmid, W=W, M=M, relu=True)

    # ---- conv2 (3x3, pad=1, stride=1): ONE matmul over row-shifted patches ----
    zrow = jnp.zeros((1, WCm), jnp.float32)
    h_idx = jax.lax.broadcasted_iota(jnp.int32, (NH, WCm), 0) % H
    y1_hm1 = jnp.concatenate([zrow, y1[:NH - 1, :]], axis=0)   # rows shifted: h-1
    y1_hm1 = jnp.where(h_idx == 0, 0.0, y1_hm1)                # zero-pad top edge
    y1_hp1 = jnp.concatenate([y1[1:, :], zrow], axis=0)        # rows shifted: h+1
    y1_hp1 = jnp.where(h_idx == H - 1, 0.0, y1_hp1)            # zero-pad bottom edge
    patches = jnp.concatenate([y1_hm1, y1, y1_hp1], axis=1)    # (NH, 3*W*Cmid)
    y2 = jnp.dot(patches.astype(jnp.bfloat16), w2_ref[...],
                 preferred_element_type=jnp.float32)           # (NH, W*Cmid) f32
    y2 = _bn_relu(y2, g2_ref[...], b2_ref[...], C=Cmid, W=W, M=M, relu=True)

    # ---- conv3 (1x1 expansion) + bn3, identity residual, final relu ----
    y3 = jnp.dot(y2.astype(jnp.bfloat16), w3_ref[...],
                 preferred_element_type=jnp.float32)           # (NH, W*Cout) f32
    y3 = _bn_relu(y3, g3_ref[...], b3_ref[...], C=Cout, W=W, M=M, relu=False)

    o_ref[...] = jnp.maximum(y3 + x, 0.0)              # full-lane, unmasked store


def prepare_params(conv1_w, g1, b1, conv2_w, g2, b2, conv3_w, g3, b3, *, W):
    """Re-layout PyTorch OIHW conv weights into lane-dense matmul weights.

    conv1/conv3 (1x1)  -> block-diagonal (W*Cin, W*Cmid) / (W*Cmid, W*Cout).
    conv2 (3x3, pad=1) -> banded (3*W*Cmid, W*Cmid): the three vertical blocks
                          are the ky taps; bands inside each block carry kx and
                          the ci->co mixing (zero columns encode the W padding).
    Matmul weights are bf16 (MXU-native on v6e/v7x); BN params stay f32.
    """
    Cmid = conv1_w.shape[0]
    eye_w = jnp.eye(W, dtype=jnp.float32)
    w1_blk = jnp.kron(eye_w, conv1_w[:, :, 0, 0].T)            # (W*Cin,  W*Cmid)
    w3_blk = jnp.kron(eye_w, conv3_w[:, :, 0, 0].T)            # (W*Cmid, W*Cout)
    bands = []
    for ky in range(3):
        band = jnp.zeros((W * Cmid, W * Cmid), jnp.float32)
        for kx in range(3):
            band = band + jnp.kron(jnp.eye(W, W, 1 - kx, dtype=jnp.float32),
                                   conv2_w[:, :, ky, kx].T)
        bands.append(band)
    w2_blk = jnp.concatenate(bands, axis=0)                    # (3*W*Cmid, W*Cmid)

    bf16 = lambda a: a.astype(jnp.bfloat16)
    row = lambda v: v.reshape(1, -1).astype(jnp.float32)
    return (bf16(w1_blk), bf16(w2_blk), bf16(w3_blk),
            row(g1), row(b1), row(g2), row(b2), row(g3), row(b3))


def bottleneck_pallas(x_nhwc, w1_blk, w2_blk, w3_blk, g1, b1, g2, b2, g3, b3):
    """Fused BottleNeck forward. x_nhwc: (N, H, W, Cin) f32. Returns NHWC f32."""
    N, H, W, Cin = x_nhwc.shape
    Cmid = w1_blk.shape[1] // W
    Cout = w3_blk.shape[1] // W
    assert Cout == Cin, \
        "identity residual requires in_channels == out_channels * expansion"

    # Lane-dense 2D view (N*H, W*C): a contiguous reshape, NOT a transpose.
    x2d = x_nhwc.reshape(N * H, W * Cin)
    NH = N * H

    kernel = functools.partial(bottleneck_kernel, N=N, H=H, W=W,
                               Cin=Cin, Cmid=Cmid, Cout=Cout)
    vmem = pl.BlockSpec(memory_space=pltpu.MemorySpace.VMEM)

    matmul_flops = 2 * NH * ((W * Cin) * (W * Cmid)
                             + (3 * W * Cmid) * (W * Cmid)
                             + (W * Cmid) * (W * Cout))
    bytes_accessed = (x2d.size * 4 + NH * W * Cout * 4
                      + (w1_blk.size + w2_blk.size + w3_blk.size) * 2
                      + 2 * (2 * Cmid + Cout) * 4)

    out2d = pl.pallas_call(
        kernel,
        out_shape=jax.ShapeDtypeStruct((NH, W * Cout), jnp.float32),
        in_specs=[vmem] * 10,
        out_specs=vmem,
        compiler_params=pltpu.CompilerParams(vmem_limit_bytes=16 * 1024 * 1024),
        cost_estimate=pl.CostEstimate(flops=int(matmul_flops),
                                      transcendentals=int(2 * Cmid + Cout),
                                      bytes_accessed=int(bytes_accessed)),
    )(x2d, w1_blk, w2_blk, w3_blk, g1, b1, g2, b2, g3, b3)
    return out2d.reshape(N, H, W, Cout)


def reference_bottleneck(x_nchw, conv1_w, g1, b1, conv2_w, g2, b2,
                         conv3_w, g3, b3):
    """Pure-JAX f32 NCHW reference mirroring the PyTorch forward (training BN)."""
    def bn(y, g, b):
        mean = y.mean(axis=(0, 2, 3), keepdims=True)
        var = ((y - mean) ** 2).mean(axis=(0, 2, 3), keepdims=True)
        return (y - mean) / jnp.sqrt(var + EPS) * g.reshape(1, -1, 1, 1) \
            + b.reshape(1, -1, 1, 1)

    def conv(y, w, pad):
        return jax.lax.conv_general_dilated(
            y, w, window_strides=(1, 1), padding=[(pad, pad), (pad, pad)],
            dimension_numbers=('NCHW', 'OIHW', 'NCHW'))

    out = jax.nn.relu(bn(conv(x_nchw, conv1_w, 0), g1, b1))
    out = jax.nn.relu(bn(conv(out, conv2_w, 1), g2, b2))
    out = bn(conv(out, conv3_w, 0), g3, b3)
    return jax.nn.relu(out + x_nchw)


if __name__ == "__main__":
    # BottleNeck(in_channels=16, out_channels=4, stride=1, downsample=None),
    # expansion=4 -> final channels = 16 == in_channels (identity residual).
    # Shape chosen so W*Cin = W*Cout = 8*16 = 128: exactly one full lane group.
    N, H, W, Cin = 2, 8, 8, 16
    Cmid = 4
    Cout = Cmid * 4          # == Cin

    key = jax.random.PRNGKey(0)
    kx, k1, k2, k3, kg = jax.random.split(key, 5)
    kg1, kb1, kg2, kb2, kg3, kb3 = jax.random.split(kg, 6)

    x_nhwc = jax.random.normal(kx, (N, H, W, Cin), dtype=jnp.float32)

    # Deterministic synthetic parameters (PyTorch OIHW conv weight shapes).
    conv1_w = 0.2 * jax.random.normal(k1, (Cmid, Cin, 1, 1), dtype=jnp.float32)
    conv2_w = 0.2 * jax.random.normal(k2, (Cmid, Cmid, 3, 3), dtype=jnp.float32)
    conv3_w = 0.2 * jax.random.normal(k3, (Cout, Cmid, 1, 1), dtype=jnp.float32)
    g1 = 1.0 + 0.1 * jax.random.normal(kg1, (Cmid,), dtype=jnp.float32)
    b1 = 0.1 * jax.random.normal(kb1, (Cmid,), dtype=jnp.float32)
    g2 = 1.0 + 0.1 * jax.random.normal(kg2, (Cmid,), dtype=jnp.float32)
    b2 = 0.1 * jax.random.normal(kb2, (Cmid,), dtype=jnp.float32)
    g3 = 1.0 + 0.1 * jax.random.normal(kg3, (Cout,), dtype=jnp.float32)
    b3 = 0.1 * jax.random.normal(kb3, (Cout,), dtype=jnp.float32)

    params = prepare_params(conv1_w, g1, b1, conv2_w, g2, b2, conv3_w, g3, b3,
                            W=W)
    out_nhwc = bottleneck_pallas(x_nhwc, *params)
    out_nhwc = jax.block_until_ready(out_nhwc)

    # f32 NCHW reference; only the test harness transposes layouts.
    x_nchw = jnp.transpose(x_nhwc, (0, 3, 1, 2))
    ref_nchw = reference_bottleneck(x_nchw, conv1_w, g1, b1, conv2_w, g2, b2,
                                    conv3_w, g3, b3)
    ref_nhwc = jnp.transpose(jax.block_until_ready(ref_nchw), (0, 2, 3, 1))

    assert out_nhwc.shape == (N, H, W, Cout)
    # bf16 MXU inputs (per perf review) vs. an all-f32 reference -> loose tol.
    err = float(jnp.max(jnp.abs(out_nhwc - ref_nhwc)))
    assert err < 5e-2, f"max abs err {err}"
    print("KERNEL_OK")
</pallas_src>

<mosaic_0001>
module attributes {stable_mosaic.version = 11 : i64} {
  func.func @bottleneck_kernel(%arg0: memref<16x128xf32, #tpu.memory_space<vmem>>, %arg1: memref<128x32xbf16, #tpu.memory_space<vmem>>, %arg2: memref<96x32xbf16, #tpu.memory_space<vmem>>, %arg3: memref<32x128xbf16, #tpu.memory_space<vmem>>, %arg4: memref<1x4xf32, #tpu.memory_space<vmem>>, %arg5: memref<1x4xf32, #tpu.memory_space<vmem>>, %arg6: memref<1x4xf32, #tpu.memory_space<vmem>>, %arg7: memref<1x4xf32, #tpu.memory_space<vmem>>, %arg8: memref<1x16xf32, #tpu.memory_space<vmem>>, %arg9: memref<1x16xf32, #tpu.memory_space<vmem>>, %arg10: memref<16x128xf32, #tpu.memory_space<vmem>>) attributes {dimension_semantics = [], scalar_prefetch = 0 : i64, scratch_operands = 0 : i64, tpu.core_type = #tpu.core_type<tc>} {
    %c0 = arith.constant 0 : index
    %c0_0 = arith.constant 0 : index
    %0 = vector.load %arg0[%c0, %c0_0] : memref<16x128xf32, #tpu.memory_space<vmem>>, vector<16x128xf32>
    %1 = arith.truncf %0 : vector<16x128xf32> to vector<16x128xbf16>
    %c0_1 = arith.constant 0 : index
    %c0_2 = arith.constant 0 : index
    %2 = vector.load %arg1[%c0_1, %c0_2] : memref<128x32xbf16, #tpu.memory_space<vmem>>, vector<128x32xbf16>
    %cst = arith.constant dense<0.000000e+00> : vector<16x32xf32>
    %3 = tpu.matmul %1, %2, %cst {dimension_numbers = #tpu.dot_dimension_numbers<[1], [0], [0], [1], [0, 0, 1, 1], [], []>} : vector<16x128xbf16>, vector<128x32xbf16>, vector<16x32xf32> -> vector<16x32xf32>
    %c0_3 = arith.constant 0 : index
    %c0_4 = arith.constant 0 : index
    %4 = vector.load %arg4[%c0_3, %c0_4] : memref<1x4xf32, #tpu.memory_space<vmem>>, vector<1x4xf32>
    %c0_5 = arith.constant 0 : index
    %c0_6 = arith.constant 0 : index
    %5 = vector.load %arg5[%c0_5, %c0_6] : memref<1x4xf32, #tpu.memory_space<vmem>>, vector<1x4xf32>
    %cst_7 = arith.constant dense<0.000000e+00> : vector<32xf32>
    %6 = vector.multi_reduction <add>, %3, %cst_7 [0] : vector<16x32xf32> to vector<32xf32>
    %7 = vector.shape_cast %6 : vector<32xf32> to vector<1x32xf32>
    %8 = arith.mulf %3, %3 : vector<16x32xf32>
    %cst_8 = arith.constant dense<0.000000e+00> : vector<32xf32>
    %9 = vector.multi_reduction <add>, %8, %cst_8 [0] : vector<16x32xf32> to vector<32xf32>
    %10 = vector.shape_cast %9 : vector<32xf32> to vector<1x32xf32>
    %11 = vector.extract_strided_slice %7 {offsets = [0, 0], sizes = [1, 4], strides = [1, 1]} : vector<1x32xf32> to vector<1x4xf32>
    %12 = vector.extract_strided_slice %10 {offsets = [0, 0], sizes = [1, 4], strides = [1, 1]} : vector<1x32xf32> to vector<1x4xf32>
    %13 = vector.extract_strided_slice %7 {offsets = [0, 4], sizes = [1, 4], strides = [1, 1]} : vector<1x32xf32> to vector<1x4xf32>
    %14 = arith.addf %11, %13 : vector<1x4xf32>
    %15 = vector.extract_strided_slice %10 {offsets = [0, 4], sizes = [1, 4], strides = [1, 1]} : vector<1x32xf32> to vector<1x4xf32>
    %16 = arith.addf %12, %15 : vector<1x4xf32>
    %17 = vector.extract_strided_slice %7 {offsets = [0, 8], sizes = [1, 4], strides = [1, 1]} : vector<1x32xf32> to vector<1x4xf32>
    %18 = arith.addf %14, %17 : vector<1x4xf32>
    %19 = vector.extract_strided_slice %10 {offsets = [0, 8], sizes = [1, 4], strides = [1, 1]} : vector<1x32xf32> to vector<1x4xf32>
    %20 = arith.addf %16, %19 : vector<1x4xf32>
    %21 = vector.extract_strided_slice %7 {offsets = [0, 12], sizes = [1, 4], strides = [1, 1]} : vector<1x32xf32> to vector<1x4xf32>
    %22 = arith.addf %18, %21 : vector<1x4xf32>
    %23 = vector.extract_strided_slice %10 {offsets = [0, 12], sizes = [1, 4], strides = [1, 1]} : vector<1x32xf32> to vector<1x4xf32>
    %24 = arith.addf %20, %23 : vector<1x4xf32>
    %25 = vector.extract_strided_slice %7 {offsets = [0, 16], sizes = [1, 4], strides = [1, 1]} : vector<1x32xf32> to vector<1x4xf32>
    %26 = arith.addf %22, %25 : vector<1x4xf32>
    %27 = vector.extract_strided_slice %10 {offsets = [0, 16], sizes = [1, 4], strides = [1, 1]} : vector<1x32xf32> to vector<1x4xf32>
    %28 = arith.addf %24, %27 : vector<1x4xf32>
    %29 = vector.extract_strided_slice %7 {offsets = [0, 20], sizes = [1, 4], strides = [1, 1]} : vector<1x32xf32> to vector<1x4xf32>
    %30 = arith.addf %26, %29 : vector<1x4xf32>
    %31 = vector.extract_strided_slice %10 {offsets = [0, 20], sizes = [1, 4], strides = [1, 1]} : vector<1x32xf32> to vector<1x4xf32>
    %32 = arith.addf %28, %31 : vector<1x4xf32>
    %33 = vector.extract_strided_slice %7 {offsets = [0, 24], sizes = [1, 4], strides = [1, 1]} : vector<1x32xf32> to vector<1x4xf32>
    %34 = arith.addf %30, %33 : vector<1x4xf32>
    %35 = vector.extract_strided_slice %10 {offsets = [0, 24], sizes = [1, 4], strides = [1, 1]} : vector<1x32xf32> to vector<1x4xf32>
    %36 = arith.addf %32, %35 : vector<1x4xf32>
    %37 = vector.extract_strided_slice %7 {offsets = [0, 28], sizes = [1, 4], strides = [1, 1]} : vector<1x32xf32> to vector<1x4xf32>
    %38 = arith.addf %34, %37 : vector<1x4xf32>
    %39 = vector.extract_strided_slice %10 {offsets = [0, 28], sizes = [1, 4], strides = [1, 1]} : vector<1x32xf32> to vector<1x4xf32>
    %40 = arith.addf %36, %39 : vector<1x4xf32>
    %cst_9 = arith.constant 7.812500e-03 : f32
    %41 = vector.broadcast %cst_9 : f32 to vector<1x4xf32>
    %42 = arith.mulf %38, %41 : vector<1x4xf32>
    %cst_10 = arith.constant 7.812500e-03 : f32
    %43 = vector.broadcast %cst_10 : f32 to vector<1x4xf32>
    %44 = arith.mulf %40, %43 : vector<1x4xf32>
    %45 = arith.mulf %42, %42 : vector<1x4xf32>
    %46 = arith.subf %44, %45 : vector<1x4xf32>
    %cst_11 = arith.constant 9.99999974E-6 : f32
    %47 = vector.broadcast %cst_11 : f32 to vector<1x4xf32>
    %48 = arith.addf %46, %47 : vector<1x4xf32>
    %49 = math.rsqrt %48 : vector<1x4xf32>
    %50 = arith.mulf %4, %49 : vector<1x4xf32>
    %51 = arith.mulf %42, %50 : vector<1x4xf32>
    %52 = arith.subf %5, %51 : vector<1x4xf32>
    %53 = tpu.concatenate %50, %50, %50, %50, %50, %50, %50, %50 in 1 : vector<1x4xf32>, vector<1x4xf32>, vector<1x4xf32>, vector<1x4xf32>, vector<1x4xf32>, vector<1x4xf32>, vector<1x4xf32>, vector<1x4xf32> -> vector<1x32xf32>
    %54 = tpu.concatenate %52, %52, %52, %52, %52, %52, %52, %52 in 1 : vector<1x4xf32>, vector<1x4xf32>, vector<1x4xf32>, vector<1x4xf32>, vector<1x4xf32>, vector<1x4xf32>, vector<1x4xf32>, vector<1x4xf32> -> vector<1x32xf32>
    %55 = vector.broadcast %53 : vector<1x32xf32> to vector<16x32xf32>
    %56 = arith.mulf %3, %55 : vector<16x32xf32>
    %57 = vector.broadcast %54 : vector<1x32xf32> to vector<16x32xf32>
    %58 = arith.addf %56, %57 : vector<16x32xf32>
    %cst_12 = arith.constant 0.000000e+00 : f32
    %59 = vector.broadcast %cst_12 : f32 to vector<16x32xf32>
    %60 = arith.maximumf %58, %59 : vector<16x32xf32>
    %cst_13 = arith.constant 0.000000e+00 : f32
    %61 = vector.broadcast %cst_13 : f32 to vector<1x32xf32>
    %62 = tpu.iota {dimensions = array<i32: 0>} : vector<16x32xi32>
    %c8_i32 = arith.constant 8 : i32
    %c0_i32 = arith.constant 0 : i32
    %63 = arith.cmpi eq, %c8_i32, %c0_i32 : i32
    %c1_i32 = arith.constant 1 : i32
    %64 = arith.select %63, %c1_i32, %c8_i32 : i32
    %65 = vector.broadcast %64 : i32 to vector<16x32xi32>
    %66 = arith.remsi %62, %65 : vector<16x32xi32>
    %c0_i32_14 = arith.constant 0 : i32
    %67 = vector.broadcast %c0_i32_14 : i32 to vector<16x32xi32>
    %68 = arith.cmpi ne, %66, %67 : vector<16x32xi32>
    %c0_i32_15 = arith.constant 0 : i32
    %69 = vector.broadcast %c0_i32_15 : i32 to vector<16x32xi32>
    %70 = arith.cmpi slt, %66, %69 : vector<16x32xi32>
    %c0_i32_16 = arith.constant 0 : i32
    %71 = arith.cmpi slt, %64, %c0_i32_16 : i32
    %72 = vector.broadcast %71 : i1 to vector<16x32xi1>
    %73 = vector.broadcast %72 : vector<16x32xi1> to vector<16x32xi1>
    %74 = arith.xori %70, %73 : vector<16x32xi1>
    %75 = arith.andi %74, %68 : vector<16x32xi1>
    %76 = vector.broadcast %64 : i32 to vector<16x32xi32>
    %77 = arith.addi %66, %76 : vector<16x32xi32>
    %78 = arith.select %75, %77, %66 : vector<16x32xi1>, vector<16x32xi32>
    %79 = vector.extract_strided_slice %60 {offsets = [0, 0], sizes = [15, 32], strides = [1, 1]} : vector<16x32xf32> to vector<15x32xf32>
    %80 = tpu.concatenate %61, %79 in 0 : vector<1x32xf32>, vector<15x32xf32> -> vector<16x32xf32>
    %c0_i32_17 = arith.constant 0 : i32
    %81 = vector.broadcast %c0_i32_17 : i32 to vector<16x32xi32>
    %82 = arith.cmpi eq, %78, %81 : vector<16x32xi32>
    %cst_18 = arith.constant 0.000000e+00 : f32
    %83 = vector.broadcast %cst_18 : f32 to vector<16x32xf32>
    %84 = arith.select %82, %83, %80 : vector<16x32xi1>, vector<16x32xf32>
    %85 = vector.extract_strided_slice %60 {offsets = [1, 0], sizes = [15, 32], strides = [1, 1]} : vector<16x32xf32> to vector<15x32xf32>
    %86 = tpu.concatenate %85, %61 in 0 : vector<15x32xf32>, vector<1x32xf32> -> vector<16x32xf32>
    %c7_i32 = arith.constant 7 : i32
    %87 = vector.broadcast %c7_i32 : i32 to vector<16x32xi32>
    %88 = arith.cmpi eq, %78, %87 : vector<16x32xi32>
    %cst_19 = arith.constant 0.000000e+00 : f32
    %89 = vector.broadcast %cst_19 : f32 to vector<16x32xf32>
    %90 = arith.select %88, %89, %86 : vector<16x32xi1>, vector<16x32xf32>
    %91 = tpu.concatenate %84, %60, %90 in 1 : vector<16x32xf32>, vector<16x32xf32>, vector<16x32xf32> -> vector<16x96xf32>
    %92 = arith.truncf %91 : vector<16x96xf32> to vector<16x96xbf16>
    %c0_20 = arith.constant 0 : index
    %c0_21 = arith.constant 0 : index
    %93 = vector.load %arg2[%c0_20, %c0_21] : memref<96x32xbf16, #tpu.memory_space<vmem>>, vector<96x32xbf16>
    %cst_22 = arith.constant dense<0.000000e+00> : vector<16x32xf32>
    %94 = tpu.matmul %92, %93, %cst_22 {dimension_numbers = #tpu.dot_dimension_numbers<[1], [0], [0], [1], [0, 0, 1, 1], [], []>} : vector<16x96xbf16>, vector<96x32xbf16>, vector<16x32xf32> -> vector<16x32xf32>
    %c0_23 = arith.constant 0 : index
    %c0_24 = arith.constant 0 : index
    %95 = vector.load %arg6[%c0_23, %c0_24] : memref<1x4xf32, #tpu.memory_space<vmem>>, vector<1x4xf32>
    %c0_25 = arith.constant 0 : index
    %c0_26 = arith.constant 0 : index
    %96 = vector.load %arg7[%c0_25, %c0_26] : memref<1x4xf32, #tpu.memory_space<vmem>>, vector<1x4xf32>
    %cst_27 = arith.constant dense<0.000000e+00> : vector<32xf32>
    %97 = vector.multi_reduction <add>, %94, %cst_27 [0] : vector<16x32xf32> to vector<32xf32>
    %98 = vector.shape_cast %97 : vector<32xf32> to vector<1x32xf32>
    %99 = arith.mulf %94, %94 : vector<16x32xf32>
    %cst_28 = arith.constant dense<0.000000e+00> : vector<32xf32>
    %100 = vector.multi_reduction <add>, %99, %cst_28 [0] : vector<16x32xf32> to vector<32xf32>
    %101 = vector.shape_cast %100 : vector<32xf32> to vector<1x32xf32>
    %102 = vector.extract_strided_slice %98 {offsets = [0, 0], sizes = [1, 4], strides = [1, 1]} : vector<1x32xf32> to vector<1x4xf32>
    %103 = vector.extract_strided_slice %101 {offsets = [0, 0], sizes = [1, 4], strides = [1, 1]} : vector<1x32xf32> to vector<1x4xf32>
    %104 = vector.extract_strided_slice %98 {offsets = [0, 4], sizes = [1, 4], strides = [1, 1]} : vector<1x32xf32> to vector<1x4xf32>
    %105 = arith.addf %102, %104 : vector<1x4xf32>
    %106 = vector.extract_strided_slice %101 {offsets = [0, 4], sizes = [1, 4], strides = [1, 1]} : vector<1x32xf32> to vector<1x4xf32>
    %107 = arith.addf %103, %106 : vector<1x4xf32>
    %108 = vector.extract_strided_slice %98 {offsets = [0, 8], sizes = [1, 4], strides = [1, 1]} : vector<1x32xf32> to vector<1x4xf32>
    %109 = arith.addf %105, %108 : vector<1x4xf32>
    %110 = vector.extract_strided_slice %101 {offsets = [0, 8], sizes = [1, 4], strides = [1, 1]} : vector<1x32xf32> to vector<1x4xf32>
    %111 = arith.addf %107, %110 : vector<1x4xf32>
    %112 = vector.extract_strided_slice %98 {offsets = [0, 12], sizes = [1, 4], strides = [1, 1]} : vector<1x32xf32> to vector<1x4xf32>
    %113 = arith.addf %109, %112 : vector<1x4xf32>
    %114 = vector.extract_strided_slice %101 {offsets = [0, 12], sizes = [1, 4], strides = [1, 1]} : vector<1x32xf32> to vector<1x4xf32>
    %115 = arith.addf %111, %114 : vector<1x4xf32>
    %116 = vector.extract_strided_slice %98 {offsets = [0, 16], sizes = [1, 4], strides = [1, 1]} : vector<1x32xf32> to vector<1x4xf32>
    %117 = arith.addf %113, %116 : vector<1x4xf32>
    %118 = vector.extract_strided_slice %101 {offsets = [0, 16], sizes = [1, 4], strides = [1, 1]} : vector<1x32xf32> to vector<1x4xf32>
    %119 = arith.addf %115, %118 : vector<1x4xf32>
    %120 = vector.extract_strided_slice %98 {offsets = [0, 20], sizes = [1, 4], strides = [1, 1]} : vector<1x32xf32> to vector<1x4xf32>
    %121 = arith.addf %117, %120 : vector<1x4xf32>
    %122 = vector.extract_strided_slice %101 {offsets = [0, 20], sizes = [1, 4], strides = [1, 1]} : vector<1x32xf32> to vector<1x4xf32>
    %123 = arith.addf %119, %122 : vector<1x4xf32>
    %124 = vector.extract_strided_slice %98 {offsets = [0, 24], sizes = [1, 4], strides = [1, 1]} : vector<1x32xf32> to vector<1x4xf32>
    %125 = arith.addf %121, %124 : vector<1x4xf32>
    %126 = vector.extract_strided_slice %101 {offsets = [0, 24], sizes = [1, 4], strides = [1, 1]} : vector<1x32xf32> to vector<1x4xf32>
    %127 = arith.addf %123, %126 : vector<1x4xf32>
    %128 = vector.extract_strided_slice %98 {offsets = [0, 28], sizes = [1, 4], strides = [1, 1]} : vector<1x32xf32> to vector<1x4xf32>
    %129 = arith.addf %125, %128 : vector<1x4xf32>
    %130 = vector.extract_strided_slice %101 {offsets = [0, 28], sizes = [1, 4], strides = [1, 1]} : vector<1x32xf32> to vector<1x4xf32>
    %131 = arith.addf %127, %130 : vector<1x4xf32>
    %cst_29 = arith.constant 7.812500e-03 : f32
    %132 = vector.broadcast %cst_29 : f32 to vector<1x4xf32>
    %133 = arith.mulf %129, %132 : vector<1x4xf32>
    %cst_30 = arith.constant 7.812500e-03 : f32
    %134 = vector.broadcast %cst_30 : f32 to vector<1x4xf32>
    %135 = arith.mulf %131, %134 : vector<1x4xf32>
    %136 = arith.mulf %133, %133 : vector<1x4xf32>
    %137 = arith.subf %135, %136 : vector<1x4xf32>
    %cst_31 = arith.constant 9.99999974E-6 : f32
    %138 = vector.broadcast %cst_31 : f32 to vector<1x4xf32>
    %139 = arith.addf %137, %138 : vector<1x4xf32>
    %140 = math.rsqrt %139 : vector<1x4xf32>
    %141 = arith.mulf %95, %140 : vector<1x4xf32>
    %142 = arith.mulf %133, %141 : vector<1x4xf32>
    %143 = arith.subf %96, %142 : vector<1x4xf32>
    %144 = tpu.concatenate %141, %141, %141, %141, %141, %141, %141, %141 in 1 : vector<1x4xf32>, vector<1x4xf32>, vector<1x4xf32>, vector<1x4xf32>, vector<1x4xf32>, vector<1x4xf32>, vector<1x4xf32>, vector<1x4xf32> -> vector<1x32xf32>
    %145 = tpu.concatenate %143, %143, %143, %143, %143, %143, %143, %143 in 1 : vector<1x4xf32>, vector<1x4xf32>, vector<1x4xf32>, vector<1x4xf32>, vector<1x4xf32>, vector<1x4xf32>, vector<1x4xf32>, vector<1x4xf32> -> vector<1x32xf32>
    %146 = vector.broadcast %144 : vector<1x32xf32> to vector<16x32xf32>
    %147 = arith.mulf %94, %146 : vector<16x32xf32>
    %148 = vector.broadcast %145 : vector<1x32xf32> to vector<16x32xf32>
    %149 = arith.addf %147, %148 : vector<16x32xf32>
    %cst_32 = arith.constant 0.000000e+00 : f32
    %150 = vector.broadcast %cst_32 : f32 to vector<16x32xf32>
    %151 = arith.maximumf %149, %150 : vector<16x32xf32>
    %152 = arith.truncf %151 : vector<16x32xf32> to vector<16x32xbf16>
    %c0_33 = arith.constant 0 : index
    %c0_34 = arith.constant 0 : index
    %153 = vector.load %arg3[%c0_33, %c0_34] : memref<32x128xbf16, #tpu.memory_space<vmem>>, vector<32x128xbf16>
    %cst_35 = arith.constant dense<0.000000e+00> : vector<16x128xf32>
    %154 = tpu.matmul %152, %153, %cst_35 {dimension_numbers = #tpu.dot_dimension_numbers<[1], [0], [0], [1], [0, 0, 1, 1], [], []>} : vector<16x32xbf16>, vector<32x128xbf16>, vector<16x128xf32> -> vector<16x128xf32>
    %c0_36 = arith.constant 0 : index
    %c0_37 = arith.constant 0 : index
    %155 = vector.load %arg8[%c0_36, %c0_37] : memref<1x16xf32, #tpu.memory_space<vmem>>, vector<1x16xf32>
    %c0_38 = arith.constant 0 : index
    %c0_39 = arith.constant 0 : index
    %156 = vector.load %arg9[%c0_38, %c0_39] : memref<1x16xf32, #tpu.memory_space<vmem>>, vector<1x16xf32>
    %cst_40 = arith.constant dense<0.000000e+00> : vector<128xf32>
    %157 = vector.multi_reduction <add>, %154, %cst_40 [0] : vector<16x128xf32> to vector<128xf32>
    %158 = vector.shape_cast %157 : vector<128xf32> to vector<1x128xf32>
    %159 = arith.mulf %154, %154 : vector<16x128xf32>
    %cst_41 = arith.constant dense<0.000000e+00> : vector<128xf32>
    %160 = vector.multi_reduction <add>, %159, %cst_41 [0] : vector<16x128xf32> to vector<128xf32>
    %161 = vector.shape_cast %160 : vector<128xf32> to vector<1x128xf32>
    %162 = vector.extract_strided_slice %158 {offsets = [0, 0], sizes = [1, 16], strides = [1, 1]} : vector<1x128xf32> to vector<1x16xf32>
    %163 = vector.extract_strided_slice %161 {offsets = [0, 0], sizes = [1, 16], strides = [1, 1]} : vector<1x128xf32> to vector<1x16xf32>
    %164 = vector.extract_strided_slice %158 {offsets = [0, 16], sizes = [1, 16], strides = [1, 1]} : vector<1x128xf32> to vector<1x16xf32>
    %165 = arith.addf %162, %164 : vector<1x16xf32>
    %166 = vector.extract_strided_slice %161 {offsets = [0, 16], sizes = [1, 16], strides = [1, 1]} : vector<1x128xf32> to vector<1x16xf32>
    %167 = arith.addf %163, %166 : vector<1x16xf32>
    %168 = vector.extract_strided_slice %158 {offsets = [0, 32], sizes = [1, 16], strides = [1, 1]} : vector<1x128xf32> to vector<1x16xf32>
    %169 = arith.addf %165, %168 : vector<1x16xf32>
    %170 = vector.extract_strided_slice %161 {offsets = [0, 32], sizes = [1, 16], strides = [1, 1]} : vector<1x128xf32> to vector<1x16xf32>
    %171 = arith.addf %167, %170 : vector<1x16xf32>
    %172 = vector.extract_strided_slice %158 {offsets = [0, 48], sizes = [1, 16], strides = [1, 1]} : vector<1x128xf32> to vector<1x16xf32>
    %173 = arith.addf %169, %172 : vector<1x16xf32>
    %174 = vector.extract_strided_slice %161 {offsets = [0, 48], sizes = [1, 16], strides = [1, 1]} : vector<1x128xf32> to vector<1x16xf32>
    %175 = arith.addf %171, %174 : vector<1x16xf32>
    %176 = vector.extract_strided_slice %158 {offsets = [0, 64], sizes = [1, 16], strides = [1, 1]} : vector<1x128xf32> to vector<1x16xf32>
    %177 = arith.addf %173, %176 : vector<1x16xf32>
    %178 = vector.extract_strided_slice %161 {offsets = [0, 64], sizes = [1, 16], strides = [1, 1]} : vector<1x128xf32> to vector<1x16xf32>
    %179 = arith.addf %175, %178 : vector<1x16xf32>
    %180 = vector.extract_strided_slice %158 {offsets = [0, 80], sizes = [1, 16], strides = [1, 1]} : vector<1x128xf32> to vector<1x16xf32>
    %181 = arith.addf %177, %180 : vector<1x16xf32>
    %182 = vector.extract_strided_slice %161 {offsets = [0, 80], sizes = [1, 16], strides = [1, 1]} : vector<1x128xf32> to vector<1x16xf32>
    %183 = arith.addf %179, %182 : vector<1x16xf32>
    %184 = vector.extract_strided_slice %158 {offsets = [0, 96], sizes = [1, 16], strides = [1, 1]} : vector<1x128xf32> to vector<1x16xf32>
    %185 = arith.addf %181, %184 : vector<1x16xf32>
    %186 = vector.extract_strided_slice %161 {offsets = [0, 96], sizes = [1, 16], strides = [1, 1]} : vector<1x128xf32> to vector<1x16xf32>
    %187 = arith.addf %183, %186 : vector<1x16xf32>
    %188 = vector.extract_strided_slice %158 {offsets = [0, 112], sizes = [1, 16], strides = [1, 1]} : vector<1x128xf32> to vector<1x16xf32>
    %189 = arith.addf %185, %188 : vector<1x16xf32>
    %190 = vector.extract_strided_slice %161 {offsets = [0, 112], sizes = [1, 16], strides = [1, 1]} : vector<1x128xf32> to vector<1x16xf32>
    %191 = arith.addf %187, %190 : vector<1x16xf32>
    %cst_42 = arith.constant 7.812500e-03 : f32
    %192 = vector.broadcast %cst_42 : f32 to vector<1x16xf32>
    %193 = arith.mulf %189, %192 : vector<1x16xf32>
    %cst_43 = arith.constant 7.812500e-03 : f32
    %194 = vector.broadcast %cst_43 : f32 to vector<1x16xf32>
    %195 = arith.mulf %191, %194 : vector<1x16xf32>
    %196 = arith.mulf %193, %193 : vector<1x16xf32>
    %197 = arith.subf %195, %196 : vector<1x16xf32>
    %cst_44 = arith.constant 9.99999974E-6 : f32
    %198 = vector.broadcast %cst_44 : f32 to vector<1x16xf32>
    %199 = arith.addf %197, %198 : vector<1x16xf32>
    %200 = math.rsqrt %199 : vector<1x16xf32>
    %201 = arith.mulf %155, %200 : vector<1x16xf32>
    %202 = arith.mulf %193, %201 : vector<1x16xf32>
    %203 = arith.subf %156, %202 : vector<1x16xf32>
    %204 = tpu.concatenate %201, %201, %201, %201, %201, %201, %201, %201 in 1 : vector<1x16xf32>, vector<1x16xf32>, vector<1x16xf32>, vector<1x16xf32>, vector<1x16xf32>, vector<1x16xf32>, vector<1x16xf32>, vector<1x16xf32> -> vector<1x128xf32>
    %205 = tpu.concatenate %203, %203, %203, %203, %203, %203, %203, %203 in 1 : vector<1x16xf32>, vector<1x16xf32>, vector<1x16xf32>, vector<1x16xf32>, vector<1x16xf32>, vector<1x16xf32>, vector<1x16xf32>, vector<1x16xf32> -> vector<1x128xf32>
    %206 = vector.broadcast %204 : vector<1x128xf32> to vector<16x128xf32>
    %207 = arith.mulf %154, %206 : vector<16x128xf32>
    %208 = vector.broadcast %205 : vector<1x128xf32> to vector<16x128xf32>
    %209 = arith.addf %207, %208 : vector<16x128xf32>
    %210 = arith.addf %209, %0 : vector<16x128xf32>
    %cst_45 = arith.constant 0.000000e+00 : f32
    %211 = vector.broadcast %cst_45 : f32 to vector<16x128xf32>
    %212 = arith.maximumf %210, %211 : vector<16x128xf32>
    %c0_46 = arith.constant 0 : index
    %c0_47 = arith.constant 0 : index
    %213 = vector.load %arg10[%c0_46, %c0_47] : memref<16x128xf32, #tpu.memory_space<vmem>>, vector<16x128xf32>
    tpu.vector_store %arg10[%c0_46, %c0_47], %212 {strides = array<i32>} : memref<16x128xf32, #tpu.memory_space<vmem>>, vector<16x128xf32>,
    return
  }
}

</mosaic_0001>

<bundles_post_ra>
// kernel: tpu_custom_call.1
= control target key start
LH: loop header
LB: loop body
LE: loop exit
PB: predicated region body
PF: predicated region fallthrough
CT: control target
= control target key end

     0   :  { %v1062_v1 = vmov 0.0   ;;  %vm1063_vm0 = vmmov 0   ;;  %s1453_s0 = inlined_call_operand.vmem [shape: f32[16,128], index: 0, kind: input, shape index: {}]   ;;  %s1454_s1 = inlined_call_operand.vmem [shape: bf16[128,32], index: 1, kind: input, shape index: {}]   ;;  %s1455_s2 = inlined_call_operand.vmem [shape: bf16[96,32], index: 2, kind: input, shape index: {}]   ;;  %s1456_s3 = inlined_call_operand.vmem [shape: bf16[32,128], index: 3, kind: input, shape index: {}]   ;;  %s1457_s4 = inlined_call_operand.vmem [shape: f32[1,4], index: 4, kind: input, shape index: {}]   ;;  %s1458_s5 = inlined_call_operand.vmem [shape: f32[1,4], index: 5, kind: input, shape index: {}]   ;;  %s1459_s6 = inlined_call_operand.vmem [shape: f32[1,4], index: 6, kind: input, shape index: {}]   ;;  %s1460_s7 = inlined_call_operand.vmem [shape: f32[1,4], index: 7, kind: input, shape index: {}]   ;;  %s1461_s8 = inlined_call_operand.vmem [shape: f32[1,16], index: 8, kind: input, shape index: {}]   ;;  %s1462_s9 = inlined_call_operand.vmem [shape: f32[1,16], index: 9, kind: input, shape index: {}]   ;;  %s1463_s10 = inlined_call_operand.hbm [shape: f32[16,128], index: 10, kind: output, shape index: {}]  }
   0x1   :  { %v1018_v0 = vld [vmem:[%s1454_s1 + $0x38] sm:$0xff]   ;;  %941 = vmatprep.subr.bf16.mxu0 %v1062_v1  ;;  %961 = vmatprep.subr.bf16.mxu1 %v1062_v1  ;;  %v1019_v2 = vld [vmem:[%s1454_s1 + $0x30] sm:$0xff]   ;;  %v1020_v3 = vld [vmem:[%s1454_s1 + $0x28] sm:$0xff]  }
   0x2   :  { %942 = vmatpush3.bf16.msra.mxu0 %v1018_v0  ;;  %957 = vmatprep.mubr.msk.bf16.mxu0 %vm1063_vm0, %v1062_v1  ;;  %v1021_v4 = vld [vmem:[%s1454_s1 + $0x20] sm:$0xff]   ;;  %v1022_v5 = vld [vmem:[%s1454_s1 + $0x18] sm:$0xff]  }
   0x3   :  { %943 = vmatprep.subr.bf16.mxu0 %v1062_v1  ;;  %973 = vmatprep.mubr.msk.bf16.mxu1 %vm1063_vm0, %v1062_v1 }
   0x6   :  { %944 = vmatpush3.bf16.msra.mxu0 %v1019_v2 }
   0x7   :  { %945 = vmatprep.subr.bf16.mxu0 %v1062_v1 }
   0xa   :  { %946 = vmatpush3.bf16.msra.mxu0 %v1020_v3 }
   0xb   :  { %947 = vmatprep.subr.bf16.mxu0 %v1062_v1 }
   0xe   :  { %948 = vmatpush3.bf16.msra.mxu0 %v1021_v4 }
   0xf   :  { %15 = vsyncpa [#allocation3], 0  ;;  %949 = vmatprep.subr.bf16.mxu0 %v1062_v1  ;;  %v1023_v6 = vld [vmem:[%s1454_s1 + $0x10] sm:$0xff]   ;;  %v1024_v7 = vld [vmem:[%s1454_s1 + $0x8] sm:$0xff]   ;;  %vm147_vm1 = vcmask 261120   ;;  %s1066_s13 = smov 116  }
  0x10   :  { %v1025_v8 = vld [vmem:[%s1454_s1] sm:$0xff]   ;;  %v1184_v10 = vld [vmem:[%s1453_s0 + $0x8] sm:$0xff]  ;;  %s1065_s1 = smov 124   ;;  %s1067_s14 = smov 112   ;;  %vm261_vm2 = vcmask 31744   ;;  %vm263_vm3 = vcmask 64512  }
  0x11   :  { %v1179_v9 = vld [vmem:[%s1453_s0] sm:$0xff]  ;;  %s1064_s0 = smov 120   ;;  %s1068_s15 = smov 108   ;;  %vm265_vm4 = vcmask 97280   ;;  %vm267_vm5 = vcmask 130048   ;;  %vm269_vm6 = vcmask 162816  }
  0x12   :  { %950 = vmatpush3.bf16.msra.mxu0 %v1022_v5  ;;  %v39_v11 = vpack.c.bf16 %v1184_v10, %v1179_v9  ;;  %s1069_s16 = smov 104   ;;  %s1070_s17 = smov 100   ;;  %vm271_vm7 = vcmask 195584   ;;  %vm273_vm8 = vcmask 228352   ;;  %vm362_vm9 = vcmask 1046528  }
  0x13   :  { %951 = vmatprep.subr.bf16.mxu0 %v1062_v1  ;;  %s1071_s22 = smov 8   ;;  %s1072_s23 = smov 4   ;;  %vm351_vm10 = vcmask 1040384   ;;  %vm389_vm15 = vcmask 523264  }
  0x14   :  { %s1074_s24 = smov 16   ;;  %s1076_s25 = smov 24  }
  0x15   :  { %s1077_s26 = smov 28   ;;  %s1079_s29 = smov 64  }
  0x16   :  { %952 = vmatpush3.bf16.msra.mxu0 %v1023_v6  ;;  %v236_v6 = vlaneseq }
  0x17   :  { %953 = vmatprep.subr.bf16.mxu0 %v1062_v1 }
  0x1a   :  { %954 = vmatpush3.bf16.msra.mxu0 %v1024_v7  ;;  %v1217_v7 = vshrl.u32 %v236_v6, 7 }
  0x1b   :  { %955 = vmatprep.subr.bf16.mxu0 %v1062_v1 }
  0x1e   :  { %956 = vmatpush3.bf16.msra.mxu0 %v1025_v8  ;;  %v145_v8 = vld [vmem:[%s1457_s4] sm:$0x1]  ;;  %s1073_s4 = smov 12  }
  0x21   :  { %958 = vmatmul.mubr.bf16.vlgmr.msra.gmra.mxu0 %v39_v11  ;;  %v1223_v11 = vsub.s32 0, %v1217_v7 }
  0xe1   :  { %v1189_v12 = vpop.f32.mrf.mxu0 }
  0xe2   :  { %v157_v14 = vmul.f32 %v1189_v12, %v1189_v12  ;;  %v148_v16 = vsel %vm147_vm1, %v1189_v12, 0.0 }
  0xe3   :  { %v959_v13 = vpop.f32.mrf.mxu0 }
  0xe4   :  { %v159_v21 = vsel %vm147_vm1, %v157_v14, 0.0 }
  0xe5   :  { %v1193_v15 = vpop.f32.mrf.mxu0 }
  0xe6   :  { %v149_v17 = vsel %vm147_vm1, %v1193_v15, 0.0  ;;  %v158_v18 = vmul.f32 %v1193_v15, %v1193_v15 }
  0xe7   :  { %v150_v19 = vadd.f32 %v149_v17, %v148_v16  ;;  %v960_v20 = vpop.f32.mrf.mxu0  ;;  %v146_v16 = vld [vmem:[%s1458_s5] sm:$0x1]  ;;  %s1075_s5 = smov 20  }
  0xe8   :  { %v160_v22 = vsel %vm147_vm1, %v158_v18, 0.0 }
  0xe9   :  { %v151_v23 = vrot.slane %v150_v19, 4  ;;  %v161_v24 = vadd.f32 %v160_v22, %v159_v21  ;;  %v1026_v21 = vld [vmem:[%s1455_s2 + $0x28] sm:$0xff]   ;;  %v1027_v22 = vld [vmem:[%s1455_s2 + $0x20] sm:$0xff]  }
  0xea   :  { %962 = vmatpush3.bf16.msra.mxu1 %v1026_v21 }
  0xeb   :  { %v152_v25 = vadd.f32 %v151_v23, %v150_v19  ;;  %v162_v26 = vrot.slane %v161_v24, 4  ;;  %963 = vmatprep.subr.bf16.mxu1 %v1062_v1  ;;  %v1028_v23 = vld [vmem:[%s1455_s2 + $0x18] sm:$0xff]  }
  0xed   :  { %v153_v27 = vrot.slane %v152_v25, 2  ;;  %v163_v28 = vadd.f32 %v162_v26, %v161_v24  ;;  %v1029_v24 = vld [vmem:[%s1455_s2 + $0x10] sm:$0xff]  }
  0xee   :  { %964 = vmatpush3.bf16.msra.mxu1 %v1027_v22 }
  0xef   :  { %v154_v29 = vadd.f32 %v153_v27, %v152_v25  ;;  %v164_v30 = vrot.slane %v163_v28, 2  ;;  %965 = vmatprep.subr.bf16.mxu1 %v1062_v1 }
  0xf1   :  { %v155_v31 = vrot.slane %v154_v29, 1  ;;  %v165_v32 = vadd.f32 %v164_v30, %v163_v28 }
  0xf2   :  { %966 = vmatpush3.bf16.msra.mxu1 %v1028_v23 }
  0xf3   :  { %v156_v33 = vadd.f32 %v155_v31, %v154_v29  ;;  %v166_v34 = vrot.slane %v165_v32, 1  ;;  %967 = vmatprep.subr.bf16.mxu1 %v1062_v1 }
  0xf5   :  { %178 = vrot.lane.b32.xlu1 %v156_v33, %s1064_s0  ;;  %169 = vrot.lane.b32.xlu0 %v156_v33, %s1065_s1  ;;  %v167_v35 = vadd.f32 %v166_v34, %v165_v32 }
  0xf6   :  { %968 = vmatpush3.bf16.msra.mxu1 %v1029_v24 }
  0xf7   :  { %969 = vmatprep.subr.bf16.mxu1 %v1062_v1 }
  0xf9   :  { %182 = vrot.lane.b32.xlu1 %v167_v35, %s1064_s0  ;;  %186 = vrot.lane.b32.xlu0 %v156_v33, %s1066_s13 }
  0xfd   :  { %190 = vrot.lane.b32.xlu1 %v167_v35, %s1066_s13  ;;  %194 = vrot.lane.b32.xlu0 %v156_v33, %s1067_s14 }
 0x101   :  { %198 = vrot.lane.b32.xlu1 %v167_v35, %s1067_s14  ;;  %174 = vrot.lane.b32.xlu0 %v167_v35, %s1065_s1 }
 0x105   :  { %206 = vrot.lane.b32.xlu1 %v167_v35, %s1068_s15  ;;  %202 = vrot.lane.b32.xlu0 %v156_v33, %s1068_s15 }
 0x109   :  { %214 = vrot.lane.b32.xlu1 %v167_v35, %s1069_s16  ;;  %210 = vrot.lane.b32.xlu0 %v156_v33, %s1069_s16 }
 0x10d   :  { %222 = vrot.lane.b32.xlu1 %v167_v35, %s1070_s17  ;;  %218 = vrot.lane.b32.xlu0 %v156_v33, %s1070_s17 }
 0x167   :  { %v179_v36 = vpop.permute.xlu1 %178  ;;  %v170_v37 = vpop.permute.xlu0 %169 }
 0x168   :  { %v172_v42 = vadd.f32 %v170_v37, %v156_v33 }
 0x16a   :  { %v181_v45 = vadd.f32 %v179_v36, %v172_v42 }
 0x16b   :  { %v183_v38 = vpop.permute.xlu1 %182  ;;  %v187_v39 = vpop.permute.xlu0 %186 }
 0x16c   :  { %v189_v50 = vadd.f32 %v187_v39, %v181_v45 }
 0x16f   :  { %v191_v40 = vpop.permute.xlu1 %190  ;;  %v195_v41 = vpop.permute.xlu0 %194 }
 0x170   :  { %v197_v52 = vadd.f32 %v195_v41, %v189_v50 }
 0x173   :  { %v199_v43 = vpop.permute.xlu1 %198  ;;  %v175_v44 = vpop.permute.xlu0 %174 }
 0x174   :  { %v177_v46 = vadd.f32 %v175_v44, %v167_v35 }
 0x176   :  { %v185_v47 = vadd.f32 %v183_v38, %v177_v46 }
 0x177   :  { %v207_v48 = vpop.permute.xlu1 %206  ;;  %v203_v49 = vpop.permute.xlu0 %202 }
 0x178   :  { %v193_v51 = vadd.f32 %v191_v40, %v185_v47  ;;  %v205_v57 = vadd.f32 %v203_v49, %v197_v52  ;;  %v1030_v49 = vld [vmem:[%s1455_s2 + $0x8] sm:$0xff]  }
 0x179   :  { %970 = vmatpush3.bf16.msra.mxu1 %v1030_v49 }
 0x17a   :  { %v201_v53 = vadd.f32 %v199_v43, %v193_v51  ;;  %971 = vmatprep.subr.bf16.mxu1 %v1062_v1 }
 0x17b   :  { %v215_v54 = vpop.permute.xlu1 %214  ;;  %v211_v55 = vpop.permute.xlu0 %210 }
 0x17c   :  { %v209_v56 = vadd.f32 %v207_v48, %v201_v53  ;;  %v213_v59 = vadd.f32 %v211_v55, %v205_v57  ;;  %v324_v53 = vadd.s32 8, %v1217_v7 }
 0x17e   :  { %v217_v58 = vadd.f32 %v215_v54, %v209_v56 }
 0x17f   :  { %v223_v60 = vpop.permute.xlu1 %222  ;;  %v219_v61 = vpop.permute.xlu0 %218 }
 0x180   :  { %v225_v62 = vadd.f32 %v223_v60, %v217_v58  ;;  %v221_v63 = vadd.f32 %v219_v61, %v213_v59  ;;  %v1031_v59 = vld [vmem:[%s1455_s2] sm:$0xff]   ;;  %v329_v60 = vand.u32 7, %v1217_v7  ;;  %v336_v61 = vand.u32 7, %v324_v53  ;;  %s1078_s2 = smov 32  }
 0x181   :  { %972 = vmatpush3.bf16.msra.mxu1 %v1031_v59 }
 0x182   :  { %v226_v0 = vmul.f32 0.0078125, %v221_v63  ;;  %v227_v2 = vmul.f32 0.0078125, %v225_v62  ;;  %977 = vmatprep.subr.bf16.mxu1 %v1062_v1  ;;  %vm1288_vm11 = vcmp.eq.s32.totalorder %v329_v60, 0  ;;  %vm1292_vm12 = vcmp.eq.s32.totalorder %v336_v61, 0 }
 0x183   :  { %vm369_vm13 = vcmp.eq.s32.totalorder %v329_v60, 7  ;;  %vm370_vm14 = vcmp.eq.s32.totalorder %v336_v61, 7 }
 0x184   :  { %v228_v3 = vmul.f32 %v226_v0, %v226_v0 }
 0x186   :  { %v229_v4 = vsub.f32 %v227_v2, %v228_v3 }
 0x188   :  { %v230_v5 = vadd.f32 1e-05, %v229_v4 }
 0x18a   :  { %1034 = vrsqrt.f32 %v230_v5 }
 0x197   :  { %v1035_v13 = vpop.eup %1034 }
 0x198   :  { %v232_v14 = vmul.f32 %v1035_v13, %v145_v8 }
 0x19a   :  { %v233_v17 = vmul.f32 %v232_v14, %v226_v0  ;;  %v239_v18 = vrot.slane %v232_v14, %v1223_v11 }
 0x19c   :  { %v234_v19 = vsub.f32 %v146_v16, %v233_v17  ;;  %243 = vrot.lane.b32.xlu1 %v239_v18, %s1071_s22  ;;  %240 = vrot.lane.b32.xlu0 %v239_v18, %s1072_s23 }
 0x19e   :  { %v279_v20 = vrot.slane %v234_v19, %v1223_v11 }
 0x1a0   :  { %246 = vrot.lane.b32.xlu0 %v239_v18, %s1073_s4  ;;  %280 = vrot.lane.b32.xlu1 %v279_v20, %s1072_s23 }
 0x1a4   :  { %249 = vrot.lane.b32.xlu0 %v239_v18, %s1074_s24  ;;  %283 = vrot.lane.b32.xlu1 %v279_v20, %s1071_s22 }
 0x1a8   :  { %252 = vrot.lane.b32.xlu0 %v239_v18, %s1075_s5  ;;  %286 = vrot.lane.b32.xlu1 %v279_v20, %s1073_s4 }
 0x1ac   :  { %255 = vrot.lane.b32.xlu0 %v239_v18, %s1076_s25  ;;  %289 = vrot.lane.b32.xlu1 %v279_v20, %s1074_s24 }
 0x1b0   :  { %258 = vrot.lane.b32.xlu0 %v239_v18, %s1077_s26  ;;  %292 = vrot.lane.b32.xlu1 %v279_v20, %s1075_s5 }
 0x1b4   :  { %295 = vrot.lane.b32.xlu0 %v279_v20, %s1076_s25  ;;  %298 = vrot.lane.b32.xlu1 %v279_v20, %s1077_s26 }
 0x20e   :  { %v244_v25 = vpop.permute.xlu1 %243  ;;  %v241_v26 = vpop.permute.xlu0 %240 }
 0x20f   :  { %v262_v33 = vsel %vm261_vm2, %v232_v14, %v241_v26 }
 0x210   :  { %v264_v34 = vsel %vm263_vm3, %v262_v33, %v244_v25 }
 0x212   :  { %v247_v27 = vpop.permute.xlu0 %246  ;;  %v281_v28 = vpop.permute.xlu1 %280 }
 0x213   :  { %v266_v37 = vsel %vm265_vm4, %v264_v34, %v247_v27  ;;  %v301_v40 = vsel %vm261_vm2, %v234_v19, %v281_v28 }
 0x216   :  { %v250_v29 = vpop.permute.xlu0 %249  ;;  %v284_v30 = vpop.permute.xlu1 %283 }
 0x217   :  { %v268_v38 = vsel %vm267_vm5, %v266_v37, %v250_v29  ;;  %v302_v44 = vsel %vm263_vm3, %v301_v40, %v284_v30 }
 0x21a   :  { %v253_v31 = vpop.permute.xlu0 %252  ;;  %v287_v32 = vpop.permute.xlu1 %286 }
 0x21b   :  { %v270_v39 = vsel %vm269_vm6, %v268_v38, %v253_v31  ;;  %v303_v46 = vsel %vm265_vm4, %v302_v44, %v287_v32 }
 0x21e   :  { %v256_v35 = vpop.permute.xlu0 %255  ;;  %v290_v36 = vpop.permute.xlu1 %289 }
 0x21f   :  { %v272_v41 = vsel %vm271_vm7, %v270_v39, %v256_v35  ;;  %v304_v47 = vsel %vm267_vm5, %v303_v46, %v290_v36 }
 0x222   :  { %v259_v42 = vpop.permute.xlu0 %258  ;;  %v293_v43 = vpop.permute.xlu1 %292 }
 0x223   :  { %v274_v45 = vsel %vm273_vm8, %v272_v41, %v259_v42  ;;  %v305_v50 = vsel %vm269_vm6, %v304_v47, %v293_v43 }
 0x224   :  { %v311_v48 = vrot.slane %v274_v45, %v1223_v11 }
 0x226   :  { %v296_v51 = vpop.permute.xlu0 %295  ;;  %v299_v52 = vpop.permute.xlu1 %298  ;;  %v312_v56 = vmul.f32 %v311_v48, %v1189_v12  ;;  %v313_v57 = vmul.f32 %v311_v48, %v1193_v15 }
 0x227   :  { %v306_v54 = vsel %vm271_vm7, %v305_v50, %v296_v51 }
 0x228   :  { %v307_v55 = vsel %vm273_vm8, %v306_v54, %v299_v52 }
 0x229   :  { %v317_v58 = vrot.slane %v307_v55, %v1223_v11 }
 0x22b   :  { %v318_v62 = vadd.f32 %v317_v58, %v312_v56  ;;  %v319_v63 = vadd.f32 %v317_v58, %v313_v57 }
 0x22d   :  { %v320_v0 = vmax.f32 %v318_v62, 0.0  ;;  %v321_v2 = vmax.f32 %v319_v63, 0.0 }
 0x22f   :  { %v352_v3 = vrot.slane %v320_v0, 7  ;;  %v353_v4 = vrot.slane %v321_v2, 7  ;;  %v363_v5 = vrot.slane %v320_v0, 1  ;;  %v1008_v6 = vpack.i.bf16 %v321_v2, %v320_v0 }
 0x230   :  { %v364_v7 = vrot.slane %v321_v2, 1 }
 0x231   :  { %1009 = vrot.lane.b32.xlu0 %v1008_v6, %s1078_s2  ;;  %v354_v8 = vsel %vm351_vm10, %v352_v3, %v353_v4  ;;  %v357_v13 = vsel %vm351_vm10, 0.0, %v352_v3 }
 0x232   :  { %v365_v14 = vsel %vm362_vm9, %v363_v5, %v364_v7  ;;  %v368_v16 = vsel %vm362_vm9, %v364_v7, 0.0  ;;  %v360_v17 = vsel %vm1288_vm11, 0.0, %v357_v13  ;;  %v361_v18 = vsel %vm1292_vm12, 0.0, %v354_v8 }
 0x233   :  { %v371_v19 = vsel %vm369_vm13, 0.0, %v365_v14  ;;  %v372_v20 = vsel %vm370_vm14, 0.0, %v368_v16  ;;  %vm441_vm9 = vcmask 785408  }
 0x234   :  { %v1013_v21 = vpack.i.bf16 %v372_v20, %v371_v19 }
 0x236   :  { %1014 = vrot.lane.b32.xlu1 %v1013_v21, %s1079_s29 }
 0x2a3   :  { %v1010_v22 = vpop.permute.xlu0 %1009 }
 0x2a4   :  { %v1012_v23 = vunpack.i.h.bf16 %v1010_v22  ;;  %v1011_v24 = vunpack.i.l.bf16 %v1010_v22 }
 0x2a6   :  { %v387_v28 = vsel %vm147_vm1, %v360_v17, %v1011_v24  ;;  %v388_v29 = vsel %vm147_vm1, %v361_v18, %v1012_v23 }
 0x2a8   :  { %v1015_v25 = vpop.permute.xlu1 %1014 }
 0x2a9   :  { %v1017_v26 = vunpack.i.h.bf16 %v1015_v25  ;;  %v1016_v27 = vunpack.i.l.bf16 %v1015_v25 }
 0x2ab   :  { %v390_v30 = vsel %vm389_vm15, %v387_v28, %v1016_v27  ;;  %v391_v31 = vsel %vm389_vm15, %v388_v29, %v1017_v26 }
 0x2ac   :  { %v392_v32 = vpack.c.bf16 %v391_v31, %v390_v30  ;;  %v486_v30 = vld [vmem:[%s1459_s6] sm:$0x1] }
 0x2ae   :  { %974 = vmatmul.mubr.msk.bf16.vlgmr.msra.gmra.mxu1 %vm441_vm9, %v392_v32 }
 0x2af   :  { %981 = vmatprep.mubr.msk.bf16.mxu1 %vm1063_vm0, %v1062_v1  ;;  %vm829_vm0 = vcmask 392192  }
 0x36e   :  { %v1311_v33 = vpop.f32.mrf.mxu1 }
 0x36f   :  { %v497_v35 = vmul.f32 %v1311_v33, %v1311_v33  ;;  %v488_v37 = vsel %vm147_vm1, %v1311_v33, 0.0 }
 0x370   :  { %v975_v34 = vpop.f32.mrf.mxu1 }
 0x371   :  { %v499_v42 = vsel %vm147_vm1, %v497_v35, 0.0  ;;  %v487_v34 = vld [vmem:[%s1460_s7] sm:$0x1] }
 0x372   :  { %v1315_v36 = vpop.f32.mrf.mxu1 }
 0x373   :  { %v489_v38 = vsel %vm147_vm1, %v1315_v36, 0.0  ;;  %v498_v39 = vmul.f32 %v1315_v36, %v1315_v36 }
 0x374   :  { %v490_v40 = vadd.f32 %v489_v38, %v488_v37  ;;  %v976_v41 = vpop.f32.mrf.mxu1 }
 0x375   :  { %v500_v43 = vsel %vm147_vm1, %v498_v39, 0.0  ;;  %v1033_v41 = vld [vmem:[%s1456_s3] sm:$0xff]  }
 0x376   :  { %v491_v44 = vrot.slane %v490_v40, 4  ;;  %v501_v45 = vadd.f32 %v500_v43, %v499_v42 }
 0x378   :  { %v492_v46 = vadd.f32 %v491_v44, %v490_v40  ;;  %v502_v47 = vrot.slane %v501_v45, 4  ;;  %v1032_v40 = vld [vmem:[%s1456_s3 + $0x8] sm:$0xff]   ;;  %s1080_s3 = smov 96  }
 0x379   :  { %978 = vmatpush3.bf16.msra.mxu1 %v1032_v40 }
 0x37a   :  { %v493_v48 = vrot.slane %v492_v46, 2  ;;  %v503_v49 = vadd.f32 %v502_v47, %v501_v45  ;;  %979 = vmatprep.subr.bf16.mxu1 %v1062_v1 }
 0x37c   :  { %v494_v50 = vadd.f32 %v493_v48, %v492_v46  ;;  %v504_v51 = vrot.slane %v503_v49, 2 }
 0x37d   :  { %980 = vmatpush3.bf16.msra.mxu1 %v1033_v41 }
 0x37e   :  { %v495_v52 = vrot.slane %v494_v50, 1  ;;  %v505_v53 = vadd.f32 %v504_v51, %v503_v49 }
 0x380   :  { %v496_v54 = vadd.f32 %v495_v52, %v494_v50  ;;  %v506_v55 = vrot.slane %v505_v53, 1 }
 0x382   :  { %v507_v56 = vadd.f32 %v506_v55, %v505_v53  ;;  %509 = vrot.lane.b32.xlu0 %v496_v54, %s1065_s1 }
 0x384   :  { %514 = vrot.lane.b32.xlu1 %v507_v56, %s1065_s1 }
 0x386   :  { %518 = vrot.lane.b32.xlu0 %v496_v54, %s1064_s0 }
 0x388   :  { %522 = vrot.lane.b32.xlu1 %v507_v56, %s1064_s0 }
 0x38a   :  { %526 = vrot.lane.b32.xlu0 %v496_v54, %s1066_s13 }
 0x38c   :  { %530 = vrot.lane.b32.xlu1 %v507_v56, %s1066_s13 }
 0x38e   :  { %534 = vrot.lane.b32.xlu0 %v496_v54, %s1067_s14 }
 0x390   :  { %538 = vrot.lane.b32.xlu1 %v507_v56, %s1067_s14 }
 0x392   :  { %542 = vrot.lane.b32.xlu0 %v496_v54, %s1068_s15 }
 0x394   :  { %546 = vrot.lane.b32.xlu1 %v507_v56, %s1068_s15 }
 0x396   :  { %550 = vrot.lane.b32.xlu0 %v496_v54, %s1069_s16 }
 0x398   :  { %554 = vrot.lane.b32.xlu1 %v507_v56, %s1069_s16 }
 0x39a   :  { %558 = vrot.lane.b32.xlu0 %v496_v54, %s1070_s17 }
 0x39c   :  { %562 = vrot.lane.b32.xlu1 %v507_v56, %s1070_s17 }
 0x3f4   :  { %v510_v57 = vpop.permute.xlu0 %509 }
 0x3f5   :  { %v512_v0 = vadd.f32 %v510_v57, %v496_v54 }
 0x3f6   :  { %v515_v58 = vpop.permute.xlu1 %514 }
 0x3f7   :  { %v517_v12 = vadd.f32 %v515_v58, %v507_v56 }
 0x3f8   :  { %v519_v59 = vpop.permute.xlu0 %518 }
 0x3f9   :  { %v521_v15 = vadd.f32 %v519_v59, %v512_v0 }
 0x3fa   :  { %v523_v60 = vpop.permute.xlu1 %522 }
 0x3fb   :  { %v525_v4 = vadd.f32 %v523_v60, %v517_v12 }
 0x3fc   :  { %v527_v61 = vpop.permute.xlu0 %526 }
 0x3fd   :  { %v529_v5 = vadd.f32 %v527_v61, %v521_v15 }
 0x3fe   :  { %v531_v62 = vpop.permute.xlu1 %530 }
 0x3ff   :  { %v533_v7 = vadd.f32 %v531_v62, %v525_v4 }
 0x400   :  { %v535_v63 = vpop.permute.xlu0 %534 }
 0x401   :  { %v537_v8 = vadd.f32 %v535_v63, %v529_v5 }
 0x402   :  { %v539_v2 = vpop.permute.xlu1 %538 }
 0x403   :  { %v541_v14 = vadd.f32 %v539_v2, %v533_v7 }
 0x404   :  { %v543_v3 = vpop.permute.xlu0 %542 }
 0x405   :  { %v545_v16 = vadd.f32 %v543_v3, %v537_v8 }
 0x406   :  { %v547_v6 = vpop.permute.xlu1 %546 }
 0x407   :  { %v549_v18 = vadd.f32 %v547_v6, %v541_v14 }
 0x408   :  { %v551_v13 = vpop.permute.xlu0 %550 }
 0x409   :  { %v553_v19 = vadd.f32 %v551_v13, %v545_v16 }
 0x40a   :  { %v555_v17 = vpop.permute.xlu1 %554 }
 0x40b   :  { %v557_v21 = vadd.f32 %v555_v17, %v549_v18 }
 0x40c   :  { %v559_v20 = vpop.permute.xlu0 %558 }
 0x40d   :  { %v561_v22 = vadd.f32 %v559_v20, %v553_v19 }
 0x40e   :  { %v563_v23 = vpop.permute.xlu1 %562 }
 0x40f   :  { %v566_v24 = vmul.f32 0.0078125, %v561_v22  ;;  %v565_v25 = vadd.f32 %v563_v23, %v557_v21 }
 0x411   :  { %v568_v26 = vmul.f32 %v566_v24, %v566_v24  ;;  %v567_v27 = vmul.f32 0.0078125, %v565_v25 }
 0x413   :  { %v569_v28 = vsub.f32 %v567_v27, %v568_v26 }
 0x415   :  { %v570_v29 = vadd.f32 1e-05, %v569_v28 }
 0x417   :  { %1036 = vrsqrt.f32 %v570_v29 }
 0x424   :  { %v1037_v31 = vpop.eup %1036 }
 0x425   :  { %v572_v32 = vmul.f32 %v1037_v31, %v486_v30 }
 0x427   :  { %v573_v35 = vmul.f32 %v572_v32, %v566_v24  ;;  %v579_v37 = vrot.slane %v572_v32, %v1223_v11 }
 0x429   :  { %v574_v38 = vsub.f32 %v487_v34, %v573_v35  ;;  %583 = vrot.lane.b32.xlu1 %v579_v37, %s1071_s22  ;;  %580 = vrot.lane.b32.xlu0 %v579_v37, %s1072_s23 }
 0x42b   :  { %v612_v39 = vrot.slane %v574_v38, %v1223_v11 }
 0x42d   :  { %586 = vrot.lane.b32.xlu0 %v579_v37, %s1073_s4  ;;  %613 = vrot.lane.b32.xlu1 %v612_v39, %s1072_s23  ;;  %s1081_s23 = smov 80  }
 0x431   :  { %589 = vrot.lane.b32.xlu0 %v579_v37, %s1074_s24  ;;  %616 = vrot.lane.b32.xlu1 %v612_v39, %s1071_s22 }
 0x435   :  { %592 = vrot.lane.b32.xlu0 %v579_v37, %s1075_s5  ;;  %619 = vrot.lane.b32.xlu1 %v612_v39, %s1073_s4  ;;  %s1082_s4 = smov 48  }
 0x439   :  { %595 = vrot.lane.b32.xlu0 %v579_v37, %s1076_s25  ;;  %622 = vrot.lane.b32.xlu1 %v612_v39, %s1074_s24 }
 0x43d   :  { %598 = vrot.lane.b32.xlu0 %v579_v37, %s1077_s26  ;;  %625 = vrot.lane.b32.xlu1 %v612_v39, %s1075_s5 }
 0x441   :  { %628 = vrot.lane.b32.xlu0 %v612_v39, %s1076_s25  ;;  %631 = vrot.lane.b32.xlu1 %v612_v39, %s1077_s26 }
 0x49b   :  { %v584_v42 = vpop.permute.xlu1 %583  ;;  %v581_v43 = vpop.permute.xlu0 %580 }
 0x49c   :  { %v601_v49 = vsel %vm261_vm2, %v572_v32, %v581_v43 }
 0x49d   :  { %v602_v50 = vsel %vm263_vm3, %v601_v49, %v584_v42 }
 0x49f   :  { %v587_v1 = vpop.permute.xlu0 %586  ;;  %v614_v44 = vpop.permute.xlu1 %613 }
 0x4a0   :  { %v603_v53 = vsel %vm265_vm4, %v602_v50, %v587_v1  ;;  %v634_v56 = vsel %vm261_vm2, %v574_v38, %v614_v44  ;;  %vm832_vm2 = vcmask 654336  }
 0x4a3   :  { %v590_v45 = vpop.permute.xlu0 %589  ;;  %v617_v46 = vpop.permute.xlu1 %616 }
 0x4a4   :  { %v604_v54 = vsel %vm267_vm5, %v603_v53, %v590_v45  ;;  %v635_v60 = vsel %vm263_vm3, %v634_v56, %v617_v46  ;;  %vm835_vm3 = vcmask 916480  }
 0x4a7   :  { %v593_v47 = vpop.permute.xlu0 %592  ;;  %v620_v48 = vpop.permute.xlu1 %619 }
 0x4a8   :  { %v605_v55 = vsel %vm269_vm6, %v604_v54, %v593_v47  ;;  %v636_v62 = vsel %vm265_vm4, %v635_v60, %v620_v48 }
 0x4ab   :  { %v596_v51 = vpop.permute.xlu0 %595  ;;  %v623_v52 = vpop.permute.xlu1 %622 }
 0x4ac   :  { %v606_v57 = vsel %vm271_vm7, %v605_v55, %v596_v51  ;;  %v637_v63 = vsel %vm267_vm5, %v636_v62, %v623_v52 }
 0x4af   :  { %v599_v58 = vpop.permute.xlu0 %598  ;;  %v626_v59 = vpop.permute.xlu1 %625 }
 0x4b0   :  { %v607_v61 = vsel %vm273_vm8, %v606_v57, %v599_v58  ;;  %v638_v2 = vsel %vm269_vm6, %v637_v63, %v626_v59 }
 0x4b1   :  { %v644_v0 = vrot.slane %v607_v61, %v1223_v11 }
 0x4b3   :  { %v629_v12 = vpop.permute.xlu0 %628  ;;  %v632_v15 = vpop.permute.xlu1 %631  ;;  %v645_v5 = vmul.f32 %v644_v0, %v1311_v33  ;;  %v646_v6 = vmul.f32 %v644_v0, %v1315_v36 }
 0x4b4   :  { %v639_v3 = vsel %vm271_vm7, %v638_v2, %v629_v12 }
 0x4b5   :  { %v640_v4 = vsel %vm273_vm8, %v639_v3, %v632_v15 }
 0x4b6   :  { %v650_v7 = vrot.slane %v640_v4, %v1223_v11 }
 0x4b8   :  { %v651_v8 = vadd.f32 %v650_v7, %v645_v5  ;;  %v652_v13 = vadd.f32 %v650_v7, %v646_v6  ;;  %v716_v5 = vld [vmem:[%s1461_s8] sm:$0x1]  ;;  %s1083_s8 = smov [#allocation2]  }
 0x4ba   :  { %v653_v14 = vmax.f32 %v651_v8, 0.0  ;;  %v654_v16 = vmax.f32 %v652_v13, 0.0  ;;  %v717_v8 = vld [vmem:[%s1462_s9] sm:$0x1]  ;;  %s893_s9 = sshll.u32 %s1083_s8, 4  ;;  %s894_s9 = int_to_ptr.vmem [resolvable:$true] %s893_s9 }
 0x4bb   :  { %p1045_p1 = scmp.lt.s32.totalorder %s894_s9, %s894_s9 }
 0x4bc   :  { %v655_v17 = vpack.c.bf16 %v654_v16, %v653_v14 }
 0x4be   :  { %982 = vmatmul.mubr.msk.bf16.vlgmr.msra.gmra.mxu1 %vm147_vm1, %v655_v17 }
 0x57e   :  { %v1387_v18 = vpop.f32.mrf.mxu1 }
 0x57f   :  { %v725_v21 = vmul.f32 %v1387_v18, %v1387_v18 }
 0x580   :  { %v983_v19 = vpop.f32.mrf.mxu1 }
 0x582   :  { %v1389_v20 = vpop.f32.mrf.mxu1 }
 0x583   :  { %v718_v33 = vadd.f32 %v1389_v20, %v1387_v18  ;;  %v726_v36 = vmul.f32 %v1389_v20, %v1389_v20 }
 0x584   :  { %v984_v22 = vpop.f32.mrf.mxu1 }
 0x585   :  { %v719_v23 = vrot.slane %v718_v33, 4  ;;  %v727_v24 = vadd.f32 %v726_v36, %v725_v21 }
 0x587   :  { %v720_v25 = vadd.f32 %v719_v23, %v718_v33  ;;  %v728_v26 = vrot.slane %v727_v24, 4 }
 0x589   :  { %v721_v27 = vrot.slane %v720_v25, 2  ;;  %v729_v28 = vadd.f32 %v728_v26, %v727_v24 }
 0x58b   :  { %v722_v29 = vadd.f32 %v721_v27, %v720_v25  ;;  %v730_v30 = vrot.slane %v729_v28, 2 }
 0x58d   :  { %v723_v31 = vrot.slane %v722_v29, 1  ;;  %v731_v32 = vadd.f32 %v730_v30, %v729_v28 }
 0x58f   :  { %v724_v34 = vadd.f32 %v723_v31, %v722_v29  ;;  %v732_v35 = vrot.slane %v731_v32, 1 }
 0x591   :  { %v733_v37 = vadd.f32 %v732_v35, %v731_v32  ;;  %735 = vrot.lane.b32.xlu0 %v724_v34, %s1067_s14 }
 0x593   :  { %740 = vrot.lane.b32.xlu1 %v733_v37, %s1067_s14 }
 0x595   :  { %744 = vrot.lane.b32.xlu0 %v724_v34, %s1080_s3 }
 0x597   :  { %748 = vrot.lane.b32.xlu1 %v733_v37, %s1080_s3 }
 0x599   :  { %752 = vrot.lane.b32.xlu0 %v724_v34, %s1081_s23 }
 0x59b   :  { %756 = vrot.lane.b32.xlu1 %v733_v37, %s1081_s23 }
 0x59d   :  { %760 = vrot.lane.b32.xlu0 %v724_v34, %s1079_s29 }
 0x59f   :  { %764 = vrot.lane.b32.xlu1 %v733_v37, %s1079_s29 }
 0x5a1   :  { %768 = vrot.lane.b32.xlu0 %v724_v34, %s1082_s4 }
 0x5a3   :  { %772 = vrot.lane.b32.xlu1 %v733_v37, %s1082_s4 }
 0x5a5   :  { %776 = vrot.lane.b32.xlu0 %v724_v34, %s1078_s2 }
 0x5a7   :  { %780 = vrot.lane.b32.xlu1 %v733_v37, %s1078_s2 }
 0x5a9   :  { %784 = vrot.lane.b32.xlu0 %v724_v34, %s1074_s24 }
 0x5ab   :  { %788 = vrot.lane.b32.xlu1 %v733_v37, %s1074_s24 }
 0x603   :  { %v736_v38 = vpop.permute.xlu0 %735 }
 0x604   :  { %v738_v44 = vadd.f32 %v736_v38, %v724_v34 }
 0x605   :  { %v741_v39 = vpop.permute.xlu1 %740 }
 0x606   :  { %v743_v46 = vadd.f32 %v741_v39, %v733_v37 }
 0x607   :  { %v745_v40 = vpop.permute.xlu0 %744 }
 0x608   :  { %v747_v47 = vadd.f32 %v745_v40, %v738_v44 }
 0x609   :  { %v749_v41 = vpop.permute.xlu1 %748 }
 0x60a   :  { %v751_v49 = vadd.f32 %v749_v41, %v743_v46 }
 0x60b   :  { %v753_v42 = vpop.permute.xlu0 %752 }
 0x60c   :  { %v755_v50 = vadd.f32 %v753_v42, %v747_v47 }
 0x60d   :  { %v757_v43 = vpop.permute.xlu1 %756 }
 0x60e   :  { %v759_v52 = vadd.f32 %v757_v43, %v751_v49 }
 0x60f   :  { %v761_v1 = vpop.permute.xlu0 %760 }
 0x610   :  { %v763_v53 = vadd.f32 %v761_v1, %v755_v50 }
 0x611   :  { %v765_v45 = vpop.permute.xlu1 %764 }
 0x612   :  { %v767_v55 = vadd.f32 %v765_v45, %v759_v52 }
 0x613   :  { %v769_v48 = vpop.permute.xlu0 %768 }
 0x614   :  { %v771_v56 = vadd.f32 %v769_v48, %v763_v53 }
 0x615   :  { %v773_v51 = vpop.permute.xlu1 %772 }
 0x616   :  { %v775_v58 = vadd.f32 %v773_v51, %v767_v55 }
 0x617   :  { %v777_v54 = vpop.permute.xlu0 %776 }
 0x618   :  { %v779_v59 = vadd.f32 %v777_v54, %v771_v56 }
 0x619   :  { %v781_v57 = vpop.permute.xlu1 %780 }
 0x61a   :  { %v783_v61 = vadd.f32 %v781_v57, %v775_v58 }
 0x61b   :  { %v785_v60 = vpop.permute.xlu0 %784 }
 0x61c   :  { %v787_v62 = vadd.f32 %v785_v60, %v779_v59 }
 0x61d   :  { %v789_v63 = vpop.permute.xlu1 %788 }
 0x61e   :  { %v792_v0 = vmul.f32 0.0078125, %v787_v62  ;;  %v791_v2 = vadd.f32 %v789_v63, %v783_v61 }
 0x620   :  { %v794_v12 = vmul.f32 %v792_v0, %v792_v0  ;;  %v793_v15 = vmul.f32 0.0078125, %v791_v2 }
 0x622   :  { %v795_v3 = vsub.f32 %v793_v15, %v794_v12 }
 0x624   :  { %v796_v4 = vadd.f32 1e-05, %v795_v3 }
 0x626   :  { %1038 = vrsqrt.f32 %v796_v4 }
 0x633   :  { %v1039_v6 = vpop.eup %1038 }
 0x634   :  { %v798_v7 = vmul.f32 %v1039_v6, %v716_v5 }
 0x636   :  { %v799_v13 = vmul.f32 %v798_v7, %v792_v0  ;;  %v805_v14 = vrot.slane %v798_v7, %v1223_v11 }
 0x638   :  { %v800_v16 = vsub.f32 %v717_v8, %v799_v13  ;;  %809 = vrot.lane.b32.xlu1 %v805_v14, %s1078_s2  ;;  %806 = vrot.lane.b32.xlu0 %v805_v14, %s1074_s24 }
 0x63a   :  { %v841_v17 = vrot.slane %v800_v16, %v1223_v11 }
 0x63c   :  { %812 = vrot.lane.b32.xlu0 %v805_v14, %s1082_s4  ;;  %842 = vrot.lane.b32.xlu1 %v841_v17, %s1074_s24 }
 0x640   :  { %815 = vrot.lane.b32.xlu0 %v805_v14, %s1079_s29  ;;  %845 = vrot.lane.b32.xlu1 %v841_v17, %s1078_s2 }
 0x644   :  { %818 = vrot.lane.b32.xlu0 %v805_v14, %s1081_s23  ;;  %848 = vrot.lane.b32.xlu1 %v841_v17, %s1082_s4 }
 0x648   :  { %821 = vrot.lane.b32.xlu0 %v805_v14, %s1080_s3  ;;  %851 = vrot.lane.b32.xlu1 %v841_v17, %s1079_s29 }
 0x64c   :  { %824 = vrot.lane.b32.xlu0 %v805_v14, %s1067_s14  ;;  %854 = vrot.lane.b32.xlu1 %v841_v17, %s1081_s23 }
 0x650   :  { %857 = vrot.lane.b32.xlu0 %v841_v17, %s1080_s3  ;;  %860 = vrot.lane.b32.xlu1 %v841_v17, %s1067_s14  ;;  %s1040_s14 = scalar_lea.vmem %s894_s9, 256 }
 0x651   :  { %p1041_p0 = scmp.ne.s32.totalorder %s894_s9, %s1040_s14  ;;  %p1046_p2 = scmp.lt.s32.totalorder %s1040_s14, %s1040_s14 }
 0x653   :  { %p1047_p3 = por %p1046_p2, %p1045_p1 }
 0x655   :  { %p1048_p4 = pnand %p1047_p3, %p1041_p0 }
 0x6aa   :  { %v810_v19 = vpop.permute.xlu1 %809  ;;  %v807_v21 = vpop.permute.xlu0 %806 }
 0x6ab   :  { %v827_v26 = vsel %vm267_vm5, %v798_v7, %v807_v21 }
 0x6ac   :  { %v828_v27 = vsel %vm147_vm1, %v827_v26, %v810_v19 }
 0x6ae   :  { %v813_v33 = vpop.permute.xlu0 %812  ;;  %v843_v36 = vpop.permute.xlu1 %842 }
 0x6af   :  { %v830_v30 = vsel %vm829_vm0, %v828_v27, %v813_v33  ;;  %v863_v34 = vsel %vm267_vm5, %v800_v16, %v843_v36 }
 0x6b2   :  { %v816_v22 = vpop.permute.xlu0 %815  ;;  %v846_v23 = vpop.permute.xlu1 %845 }
 0x6b3   :  { %v831_v31 = vsel %vm389_vm15, %v830_v30, %v816_v22  ;;  %v864_v39 = vsel %vm147_vm1, %v863_v34, %v846_v23 }
 0x6b6   :  { %v819_v24 = vpop.permute.xlu0 %818  ;;  %v849_v25 = vpop.permute.xlu1 %848 }
 0x6b7   :  { %v833_v32 = vsel %vm832_vm2, %v831_v31, %v819_v24  ;;  %v865_v41 = vsel %vm829_vm0, %v864_v39, %v849_v25 }
 0x6ba   :  { %v822_v28 = vpop.permute.xlu0 %821  ;;  %v852_v29 = vpop.permute.xlu1 %851 }
 0x6bb   :  { %v834_v35 = vsel %vm441_vm9, %v833_v32, %v822_v28  ;;  %v866_v42 = vsel %vm389_vm15, %v865_v41, %v852_v29 }
 0x6be   :  { %v825_v37 = vpop.permute.xlu0 %824  ;;  %v855_v38 = vpop.permute.xlu1 %854 }
 0x6bf   :  { %v836_v40 = vsel %vm835_vm3, %v834_v35, %v825_v37  ;;  %v867_v1 = vsel %vm832_vm2, %v866_v42, %v855_v38 }
 0x6c0   :  { %v873_v43 = vrot.slane %v836_v40, %v1223_v11 }
 0x6c2   :  { %v858_v44 = vpop.permute.xlu0 %857  ;;  %v861_v45 = vpop.permute.xlu1 %860  ;;  %v874_v48 = vmul.f32 %v873_v43, %v1387_v18  ;;  %v875_v49 = vmul.f32 %v873_v43, %v1389_v20 }
 0x6c3   :  { %v868_v46 = vsel %vm441_vm9, %v867_v1, %v858_v44 }
 0x6c4   :  { %v869_v47 = vsel %vm835_vm3, %v868_v46, %v861_v45 }
 0x6c5   :  { %v879_v50 = vrot.slane %v869_v47, %v1223_v11 }
 0x6c7   :  { %v880_v51 = vadd.f32 %v879_v50, %v874_v48  ;;  %v881_v52 = vadd.f32 %v879_v50, %v875_v49 }
 0x6c9   :  { %v882_v53 = vadd.f32 %v880_v51, %v1179_v9  ;;  %v883_v54 = vadd.f32 %v881_v52, %v1184_v10 }
 0x6cb   :  { %v884_v55 = vmax.f32 %v882_v53, 0.0  ;;  %v885_v56 = vmax.f32 %v883_v54, 0.0 }
 0x6cd   :  { %886 = vst [vmem:[#allocation2] sm:$0xff] %v884_v55  ;;  %887 = vst [vmem:[#allocation2 + $0x8] sm:$0xff] %v885_v56 }
 0x6ce   :  { %1051 = shalt.err (!%p1048_p4)
}
 0x6cf   :  { %s1084_s24 = smov 128  }
 0x6d0   :  { %899 = dma.vmem_to_hbm [thread:$0]  %s894_s9, 256, %s1463_s10, [#allocation3], %s1084_s24, %s1084_s24, %s1071_s22  }
 0x6d1   :  { %1060 = dma.done.wait [#allocation3], 256  }
 0x6d2   :  { %1061 = vsyncadd [#allocation3], 4294967040 }
 0x6d3   :  { %903 = vsyncpa [#allocation3], 1 }

</bundles_post_ra>
